<compile_context>
chip_gen: v7x
topology: tpu7x:2x2x1
jax: 0.10.0
libtpu: 0.0.40
codegen_flags: <defaults>
</compile_context>

<pallas_src>
import math
import jax
import jax.numpy as jnp
from jax import lax
from jax.experimental import pallas as pl
from jax.experimental.pallas import tpu as pltpu


# ----------------------------- config / helpers -----------------------------
_TM_CAP = 512
_TN_CAP = 512
_TK_CAP = 1024
_FULL_K_MAX = 2048          # contraction sizes up to this use the single-K-block path

try:
    _DEVICE_KIND = jax.devices()[0].device_kind.lower()
except Exception:           # pragma: no cover
    _DEVICE_KIND = ""
_IS_V7X = "v7" in _DEVICE_KIND
# v7x: 64 MiB VMEM / TensorCore -> cap at 48 MiB; v5e/v6e have 128 MiB physical.
_VMEM_LIMIT = (48 if _IS_V7X else 64) * 1024 * 1024


def _round_up(x, m):
    return ((x + m - 1) // m) * m


def _sublane_mult(dtype):
    # f32 -> 8, bf16 -> 16, int8/fp8 -> 32 (packed sublane tile)
    return max(8, 32 // jnp.dtype(dtype).itemsize)


# --------------------------------- kernels ----------------------------------
def _linear_fullk_kernel(x_ref, wt_ref, b_ref, o_ref):
    """Single contraction block: out = x @ W^T + b, bias fused inline."""
    o_ref[...] = (jnp.dot(x_ref[...], wt_ref[...],
                          preferred_element_type=jnp.float32)
                  + b_ref[...].astype(jnp.float32)).astype(o_ref.dtype)


def _linear_ktiled_f32_kernel(x_ref, wt_ref, b_ref, o_ref):
    """K-tiled, f32 output: accumulate straight into the resident output block."""
    k = pl.program_id(2)

    @pl.when(k == 0)
    def _():
        o_ref[...] = jnp.broadcast_to(b_ref[...].astype(o_ref.dtype), o_ref.shape)

    o_ref[...] += jnp.dot(x_ref[...], wt_ref[...],
                          preferred_element_type=jnp.float32)


def _linear_ktiled_acc_kernel(x_ref, wt_ref, b_ref, o_ref, acc_ref):
    """K-tiled, low-precision output: f32 scratch accumulator + epilogue cast."""
    k = pl.program_id(2)

    @pl.when(k == 0)
    def _():
        acc_ref[...] = jnp.zeros_like(acc_ref)

    acc_ref[...] += jnp.dot(x_ref[...], wt_ref[...],
                            preferred_element_type=jnp.float32)

    @pl.when(k == pl.num_programs(2) - 1)
    def _():
        o_ref[...] = (acc_ref[...] + b_ref[...].astype(jnp.float32)
                      ).astype(o_ref.dtype)


# -------------------------------- wrappers -----------------------------------
def prepare_random_linear(weight, bias, compute_dtype=None,
                          full_k_max=_FULL_K_MAX, tk=_TK_CAP):
    """One-time parameter prep (do this once, not per forward call).

    Caches W^T pre-transposed, cast to the compute dtype, and zero-padded to
    tile-aligned shapes so forward() does no per-call layout work.
    weight: (n_out, n_in) in PyTorch nn.Linear layout; bias: (n_out,).
    """
    n_out, n_in = weight.shape
    cdt = jnp.dtype(compute_dtype) if compute_dtype is not None else weight.dtype

    tn = min(_TN_CAP, _round_up(n_out, 128))
    Np = _round_up(n_out, tn)
    if n_in <= full_k_max:
        tk_eff, Kp = n_in, n_in            # single contraction block, no K padding
    else:
        tk_eff = tk
        Kp = _round_up(n_in, tk_eff)

    wt = jnp.pad(weight.T.astype(cdt), ((0, Kp - n_in), (0, Np - n_out)))
    b = jnp.pad(bias.astype(cdt).reshape(1, n_out), ((0, 0), (0, Np - n_out)))
    return dict(wt=wt, b=b, n_in=n_in, n_out=n_out,
                tn=tn, tk=tk_eff, Np=Np, Kp=Kp)


def random_linear_forward(x, params):
    """Pallas TPU implementation of Random_Linear.forward (the `mean` Linear).

    x: (B, n_in) -> returns (B, n_out) = x @ weight.T + bias
    """
    B, n_in = x.shape
    assert n_in == params["n_in"], "x / weight inner-dim mismatch"
    wt, b = params["wt"], params["b"]
    n_out, Np, Kp = params["n_out"], params["Np"], params["Kp"]
    tn, tk = params["tn"], params["tk"]

    out_dtype = x.dtype
    if x.dtype != wt.dtype:
        x = x.astype(wt.dtype)             # explicit compute-dtype cast

    tm = min(_TM_CAP, _round_up(B, _sublane_mult(x.dtype)))
    grid_m = pl.cdiv(B, tm)
    # v7x has 2 TensorCores: make sure the parallel (M x N) grid has >= 2 tiles.
    if _IS_V7X and grid_m * (Np // tn) == 1 and tn % 256 == 0:
        tn //= 2
    grid_n = Np // tn

    cost = pl.CostEstimate(
        flops=2 * B * n_in * n_out,
        transcendentals=0,
        bytes_accessed=(x.size * x.dtype.itemsize
                        + wt.size * wt.dtype.itemsize
                        + b.size * b.dtype.itemsize
                        + B * n_out * jnp.dtype(out_dtype).itemsize))

    if Kp == n_in:
        # ---- full-K fast path: no K loop, no scratch, bias fused inline ----
        return pl.pallas_call(
            _linear_fullk_kernel,
            out_shape=jax.ShapeDtypeStruct((B, n_out), out_dtype),
            grid_spec=pltpu.PrefetchScalarGridSpec(
                num_scalar_prefetch=0,
                grid=(grid_m, grid_n),
                in_specs=[
                    pl.BlockSpec((tm, n_in), lambda i, j: (i, 0)),   # x tile
                    pl.BlockSpec((n_in, tn), lambda i, j: (0, j)),   # cached W^T tile
                    pl.BlockSpec((1, tn), lambda i, j: (0, j)),      # bias tile
                ],
                out_specs=pl.BlockSpec((tm, tn), lambda i, j: (i, j)),
            ),
            compiler_params=pltpu.CompilerParams(
                dimension_semantics=("parallel", "parallel"),
                vmem_limit_bytes=_VMEM_LIMIT),
            cost_estimate=cost,
        )(x, wt, b)

    # ---- K-tiled path (large n_in) ----
    if n_in != Kp:
        # Only for very large, non-tile-multiple n_in: zero-pad K so the K-tail
        # of x never reads garbage (W^T was already zero-padded at prep time).
        x = jnp.pad(x, ((0, 0), (0, Kp - n_in)))

    if jnp.dtype(out_dtype) == jnp.float32:
        kernel, scratch = _linear_ktiled_f32_kernel, []
    else:
        kernel, scratch = (_linear_ktiled_acc_kernel,
                           [pltpu.VMEM((tm, tn), jnp.float32)])

    return pl.pallas_call(
        kernel,
        out_shape=jax.ShapeDtypeStruct((B, n_out), out_dtype),
        grid_spec=pltpu.PrefetchScalarGridSpec(
            num_scalar_prefetch=0,
            grid=(grid_m, grid_n, Kp // tk),
            in_specs=[
                pl.BlockSpec((tm, tk), lambda i, j, k: (i, k)),   # x tile
                pl.BlockSpec((tk, tn), lambda i, j, k: (k, j)),   # cached W^T tile
                pl.BlockSpec((1, tn), lambda i, j, k: (0, j)),    # bias tile
            ],
            out_specs=pl.BlockSpec((tm, tn), lambda i, j, k: (i, j)),
            scratch_shapes=scratch,
        ),
        compiler_params=pltpu.CompilerParams(
            dimension_semantics=("parallel", "parallel", "arbitrary"),
            vmem_limit_bytes=_VMEM_LIMIT),
        cost_estimate=cost,
    )(x, wt, b)


def init_random_linear_params(key, n_in, n_out, dtype=jnp.float32):
    """nn.Linear default init: U(-1/sqrt(n_in), 1/sqrt(n_in)) for weight & bias."""
    kw, kb = jax.random.split(key)
    bound = 1.0 / math.sqrt(n_in)
    weight = jax.random.uniform(kw, (n_out, n_in), dtype, -bound, bound)
    bias = jax.random.uniform(kb, (n_out,), dtype, -bound, bound)
    # TODO(synk): log_prob / sample / sample_p / check_grad (stochastic weight
    # draws) are not part of forward(); only the mean Linear is implemented.
    return weight, bias


# ----------------------------------- demo ------------------------------------
if __name__ == "__main__":
    key = jax.random.PRNGKey(0)
    k1, k2, k3, k4, k5, k6 = jax.random.split(key, 6)

    # --- test 1: tiny layer -> full-K fast path (single grid step, no scratch)
    B, n_in, n_out = 8, 32, 16
    x = jax.random.normal(k1, (B, n_in), dtype=jnp.float32)
    w, bi = init_random_linear_params(k2, n_in, n_out)
    params = prepare_random_linear(w, bi)              # cached once
    y = random_linear_forward(x, params)
    jax.block_until_ready(y)
    y_ref = jnp.dot(x, w.T, precision=lax.Precision.HIGHEST) + bi
    assert y.shape == (B, n_out)
    assert jnp.allclose(y, y_ref, atol=1e-4, rtol=1e-4)

    # --- test 2: force the K-tiled f32 path (K pad + masked-N boundary store)
    B2, n_in2, n_out2 = 16, 200, 160
    x2 = jax.random.normal(k3, (B2, n_in2), dtype=jnp.float32)
    w2, bi2 = init_random_linear_params(k4, n_in2, n_out2)
    params2 = prepare_random_linear(w2, bi2, full_k_max=0, tk=128)
    y2 = random_linear_forward(x2, params2)
    jax.block_until_ready(y2)
    y2_ref = jnp.dot(x2, w2.T, precision=lax.Precision.HIGHEST) + bi2
    assert y2.shape == (B2, n_out2)
    assert jnp.allclose(y2, y2_ref, atol=1e-4, rtol=1e-4)

    # --- test 3: bf16 compute / output -> K-tiled path with f32 scratch acc
    B3, n_in3, n_out3 = 16, 256, 128
    w3, bi3 = init_random_linear_params(k5, n_in3, n_out3)
    params3 = prepare_random_linear(w3, bi3, compute_dtype=jnp.bfloat16,
                                    full_k_max=0, tk=128)
    x3 = jax.random.normal(k6, (B3, n_in3), dtype=jnp.float32).astype(jnp.bfloat16)
    y3 = random_linear_forward(x3, params3)
    jax.block_until_ready(y3)
    y3_ref = (jnp.dot(x3.astype(jnp.float32),
                      w3.astype(jnp.bfloat16).T.astype(jnp.float32),
                      precision=lax.Precision.HIGHEST)
              + bi3.astype(jnp.bfloat16).astype(jnp.float32))
    assert y3.shape == (B3, n_out3)
    assert jnp.allclose(y3.astype(jnp.float32), y3_ref, atol=2e-2, rtol=2e-2)

    print("KERNEL_OK")
</pallas_src>

<mosaic_0001>
module attributes {stable_mosaic.version = 11 : i64} {
  func.func @_linear_fullk_kernel(%arg0: i32, %arg1: i32, %arg2: memref<8x32xf32, #tpu.memory_space<vmem>>, %arg3: memref<32x128xf32, #tpu.memory_space<vmem>>, %arg4: memref<1x128xf32, #tpu.memory_space<vmem>>, %arg5: memref<8x128xf32, #tpu.memory_space<vmem>>) attributes {dimension_semantics = [#tpu.dimension_semantics<parallel>, #tpu.dimension_semantics<parallel>], iteration_bounds = array<i64: 1, 1>, scalar_prefetch = 0 : i64, scratch_operands = 0 : i64, tpu.core_type = #tpu.core_type<tc>, window_params = [{transform_indices = @transform_0, window_bounds = array<i64: 8, 32>}, {transform_indices = @transform_1, window_bounds = array<i64: 32, 128>}, {transform_indices = @transform_2, window_bounds = array<i64: 1, 128>}, {transform_indices = @transform_3, window_bounds = array<i64: 8, 128>}]} {
    %c0 = arith.constant 0 : index
    %c0_0 = arith.constant 0 : index
    %0 = vector.load %arg2[%c0, %c0_0] : memref<8x32xf32, #tpu.memory_space<vmem>>, vector<8x32xf32>
    %c0_1 = arith.constant 0 : index
    %c0_2 = arith.constant 0 : index
    %1 = vector.load %arg3[%c0_1, %c0_2] : memref<32x128xf32, #tpu.memory_space<vmem>>, vector<32x128xf32>
    %cst = arith.constant dense<0.000000e+00> : vector<8x128xf32>
    %2 = tpu.matmul %0, %1, %cst {dimension_numbers = #tpu.dot_dimension_numbers<[1], [0], [0], [1], [0, 0, 1, 1], [], []>} : vector<8x32xf32>, vector<32x128xf32>, vector<8x128xf32> -> vector<8x128xf32>
    %c0_3 = arith.constant 0 : index
    %c0_4 = arith.constant 0 : index
    %3 = vector.load %arg4[%c0_3, %c0_4] : memref<1x128xf32, #tpu.memory_space<vmem>>, vector<1x128xf32>
    %4 = vector.broadcast %3 : vector<1x128xf32> to vector<8x128xf32>
    %5 = arith.addf %2, %4 : vector<8x128xf32>
    %c0_5 = arith.constant 0 : index
    %c0_6 = arith.constant 0 : index
    %6 = vector.load %arg5[%c0_5, %c0_6] : memref<8x128xf32, #tpu.memory_space<vmem>>, vector<8x128xf32>
    tpu.vector_store %arg5[%c0_5, %c0_6], %5 {strides = array<i32>} : memref<8x128xf32, #tpu.memory_space<vmem>>, vector<8x128xf32>,
    return
  }
  func.func @transform_0(%arg0: i32, %arg1: i32) -> (i32, i32) {
    %c0_i32 = arith.constant 0 : i32
    %c0_i32_0 = arith.constant 0 : i32
    return %arg0, %c0_i32 : i32, i32
  }
  func.func @transform_1(%arg0: i32, %arg1: i32) -> (i32, i32) {
    %c0_i32 = arith.constant 0 : i32
    %c0_i32_0 = arith.constant 0 : i32
    return %c0_i32, %arg1 : i32, i32
  }
  func.func @transform_2(%arg0: i32, %arg1: i32) -> (i32, i32) {
    %c0_i32 = arith.constant 0 : i32
    %c0_i32_0 = arith.constant 0 : i32
    return %c0_i32, %arg1 : i32, i32
  }
  func.func @transform_3(%arg0: i32, %arg1: i32) -> (i32, i32) {
    %c0_i32 = arith.constant 0 : i32
    return %arg0, %arg1 : i32, i32
  }
}

</mosaic_0001>

<bundles_post_ra>
// kernel: tpu_custom_call.1
= control target key start
LH: loop header
LB: loop body
LE: loop exit
PB: predicated region body
PF: predicated region fallthrough
CT: control target
= control target key end

     0   :  { %8 = vsyncpa [#allocation3], 0  ;;  %s359_s0 = inlined_call_operand.hbm [shape: f32[8,32], index: 0, kind: input, shape index: {}]   ;;  %s360_s1 = inlined_call_operand.hbm [shape: f32[32,128], index: 1, kind: input, shape index: {}]   ;;  %s361_s2 = inlined_call_operand.hbm [shape: f32[1,128], index: 2, kind: input, shape index: {}]   ;;  %s362_s3 = inlined_call_operand.hbm [shape: f32[8,16], index: 3, kind: output, shape index: {}]  }
   0x1   :  { %9 = vsyncpa [#allocation6], 0 }
   0x2   :  { %10 = vsyncpa [#allocation4], 0  ;;  %s282_s12 = smov [#allocation5]   ;;  %s188_s16 = scalar_lea.hbm %s360_s1, 512 }
   0x3   :  { %s26_s13 = sshll.u32 %s282_s12, 4  ;;  %p189_p0 = scmp.ne.s32.totalorder %s360_s1, %s188_s16  ;;  %s27_s13 = int_to_ptr.vmem [resolvable:$true] %s26_s13 }
   0x4   :  { %p192_p1 = scmp.lt.u32.totalorder %s188_s16, %s360_s1 }
   0x6   :  { %p194_p2 = pnand %p192_p1, %p189_p0 }
   0x8   :  { %197 = shalt.err (!%p194_p2)
}
   0x9   :  { %s198_s21 = scalar_lea.vmem %s27_s13, 512  ;;  %p203_p4 = scmp.lt.s32.totalorder %s27_s13, %s27_s13 }
   0xa   :  { %p199_p3 = scmp.ne.s32.totalorder %s27_s13, %s198_s21  ;;  %p204_p5 = scmp.lt.s32.totalorder %s198_s21, %s198_s21 }
   0xc   :  { %p205_p6 = por %p204_p5, %p203_p4 }
   0xe   :  { %p206_p7 = pnand %p205_p6, %p199_p3 }
  0x10   :  { %209 = shalt.err (!%p206_p7)
}
  0x11   :  { %s283_s22 = smov 128   ;;  %s284_s23 = smov 8  }
  0x12   :  { %32 = dma.hbm_to_vmem [thread:$0]  %s360_s1, 512, %s27_s13, [#allocation6], %s283_s22, %s283_s22, %s284_s23  }
  0x13   :  { %s285_s26 = smov [#allocation2]   ;;  %s286_s28 = smov [#allocation7]  }
  0x14   :  { %s17_s27 = sshll.u32 %s285_s26, 4  ;;  %s39_s29 = sshll.u32 %s286_s28, 4  ;;  %s18_s27 = int_to_ptr.vmem [resolvable:$true] %s17_s27  ;;  %s40_s29 = int_to_ptr.vmem [resolvable:$true] %s39_s29 }
  0x15   :  { %s210_s5 = scalar_lea.hbm %s359_s0, 128 }
  0x16   :  { %p211_p8 = scmp.ne.s32.totalorder %s359_s0, %s210_s5  ;;  %p214_p9 = scmp.lt.u32.totalorder %s210_s5, %s359_s0 }
  0x18   :  { %p216_p10 = pnand %p214_p9, %p211_p8 }
  0x1a   :  { %219 = shalt.err (!%p216_p10)
}
  0x1b   :  { %s220_s1 = scalar_lea.vmem %s18_s27, 128  ;;  %p225_p12 = scmp.lt.s32.totalorder %s18_s27, %s18_s27 }
  0x1c   :  { %p221_p11 = scmp.ne.s32.totalorder %s18_s27, %s220_s1  ;;  %p226_p13 = scmp.lt.s32.totalorder %s220_s1, %s220_s1 }
  0x1e   :  { %p227_p0 = por %p226_p13, %p225_p12 }
  0x20   :  { %p228_p1 = pnand %p227_p0, %p221_p11 }
  0x22   :  { %231 = shalt.err (!%p228_p1)
}
  0x23   :  { %20 = dma.hbm_to_vmem [thread:$0]  %s359_s0, 128, %s18_s27, [#allocation3]  }
  0x24   :  { %s232_s14 = scalar_lea.hbm %s361_s2, 16 }
  0x25   :  { %p233_p2 = scmp.ne.s32.totalorder %s361_s2, %s232_s14  ;;  %p236_p3 = scmp.lt.u32.totalorder %s232_s14, %s361_s2 }
  0x27   :  { %p238_p4 = pnand %p236_p3, %p233_p2 }
  0x29   :  { %241 = shalt.err (!%p238_p4)
}
  0x2a   :  { %s242_s19 = scalar_lea.vmem %s40_s29, 16  ;;  %s246_s20 = scalar_lea.vmem %s40_s29, 32 }
  0x2b   :  { %p243_p5 = scmp.ne.s32.totalorder %s40_s29, %s242_s19  ;;  %p247_p6 = scmp.lt.s32.totalorder %s40_s29, %s40_s29 }
  0x2c   :  { %p248_p7 = scmp.lt.s32.totalorder %s246_s20, %s242_s19 }
  0x2e   :  { %p249_p8 = por %p248_p7, %p247_p6 }
  0x30   :  { %p250_p9 = pnand %p249_p8, %p243_p5 }
  0x32   :  { %253 = shalt.err (!%p250_p9)
}
  0x33   :  { %42 = dma.hbm_to_vmem [thread:$0]  %s361_s2, 16, %s40_s29, [#allocation6]  }
  0x34   :  { %276 = dma.done.wait [#allocation3], 128  }
  0x35   :  { %277 = vsyncadd [#allocation3], 4294967168 }
  0x36   :  { %278 = dma.done.wait [#allocation6], 528  }
  0x37   :  { %279 = vsyncadd [#allocation6], 4294966768  ;;  %v287_v0 = vmov 0.0|0.0   ;;  %vm288_vm0 = vmmov 0   ;;  %v289_v1 = vmov 0.0   ;;  %v53_v2 = vld [vmem:[#allocation5] sm:$0xff] }
  0x38   :  { %173 = vmatprep.subr.bf16.mxu0 %v287_v0  ;;  %170 = vmatprep.mubr.msk.f32.mxu0 %vm288_vm0, %v289_v1  ;;  %v54_v3 = vld [vmem:[#allocation5 + $0x8] sm:$0xff]  ;;  %v55_v4 = vld [vmem:[#allocation5 + $0x10] sm:$0xff]  ;;  %v56_v6 = vld [vmem:[#allocation5 + $0x18] sm:$0xff]  ;;  %vm64_vm1 = vcmask 261120   ;;  %s290_s2 = smov [#allocation8]  }
  0x39   :  { %v174_v5 = vpack.c.bf16 %v54_v3, %v53_v2  ;;  %v177_v7 = vpack.c.bf16 %v56_v6, %v55_v4  ;;  %v52_v8 = vld [vmem:[#allocation2] sm:$0xff]  ;;  %v155_v9 = vld [vmem:[#allocation7] ss:$0 sm:$0xff]  ;;  %s145_s22 = sshll.u32 %s290_s2, 4  ;;  %s146_s22 = int_to_ptr.vmem [resolvable:$true] %s145_s22 }
  0x3a   :  { %s254_s23 = scalar_lea.vmem %s146_s22, 128  ;;  %p259_p11 = scmp.lt.s32.totalorder %s146_s22, %s146_s22 }
  0x3b   :  { %175 = vmatpush3.bf16.msra.mxu0 %v174_v5  ;;  %p255_p10 = scmp.ne.s32.totalorder %s146_s22, %s254_s23  ;;  %p260_p12 = scmp.lt.s32.totalorder %s254_s23, %s254_s23 }
  0x3c   :  { %176 = vmatprep.subr.bf16.mxu0 %v287_v0 }
  0x3d   :  { %p261_p13 = por %p260_p12, %p259_p11 }
  0x3f   :  { %178 = vmatpush3.bf16.msra.mxu0 %v177_v7  ;;  %p262_p0 = pnand %p261_p13, %p255_p10 }
  0x42   :  { %171 = vmatmul.mubr.msk.f32.vlgmr.msra.gmra.mrb[0].mxu0 %vm64_vm1, %v52_v8 }
 0x115   :  { %v134_v10 = vpop.f32.mrb[0].mxu0 }
 0x116   :  { %v135_v11 = vadd.f32 %v155_v9, %v134_v10  ;;  %v172_v12 = vpop.f32.mrb[1].mxu0 }
 0x118   :  { %138 = vst [vmem:[#allocation8] sm:$0xff] %v135_v11 }
 0x119   :  { %265 = shalt.err (!%p262_p0)
}
 0x11a   :  { %s266_s26 = scalar_lea.hbm %s362_s3, 128 }
 0x11b   :  { %p267_p1 = scmp.ne.s32.totalorder %s362_s3, %s266_s26  ;;  %p270_p2 = scmp.lt.u32.totalorder %s266_s26, %s362_s3 }
 0x11d   :  { %p272_p3 = pnand %p270_p2, %p267_p1 }
 0x11f   :  { %275 = shalt.err (!%p272_p3)
}
 0x120   :  { %148 = dma.vmem_to_hbm [thread:$0]  %s146_s22, 128, %s362_s3, [#allocation4]  }
 0x121   :  { %280 = dma.done.wait [#allocation4], 128  }
 0x122   :  { %281 = vsyncadd [#allocation4], 4294967168 }
 0x123   :  { %152 = vsyncpa [#allocation3], 1 }
 0x124   :  { %153 = vsyncpa [#allocation6], 1 }
 0x125   :  { %154 = vsyncpa [#allocation4], 1 }

</bundles_post_ra>
